<compile_context>
chip_gen: v7x
topology: tpu7x:2x2x1
jax: 0.10.0
libtpu: 0.0.40
codegen_flags: <defaults>
</compile_context>

<pallas_src>
import functools

import jax
import jax.numpy as jnp
from jax.experimental import pallas as pl
from jax.experimental.pallas import tpu as pltpu

LANE = 128  # pad num_classes to a multiple of the lane width


def _round_up(x, m):
    return (x + m - 1) // m * m


def classify_kernel(x_ref, w_ref, b_ref, o_ref, *, w_resident, tc):
    # x_ref: (tn, HW, tc) bf16  -- C on lanes, H*W on sublanes.
    # w_ref: (tc, Kp) bf16 (streamed) or (Cp, Kp) bf16 (VMEM-resident).
    # b_ref: (1, Kp) f32.
    # o_ref: (tn, Kp) f32 -- resident accumulator across the C grid axis.
    c = pl.program_id(1)

    @pl.when(c == 0)
    def _init():
        # Fold the bias add into the accumulator init (output block is
        # resident across the C reduction axis).
        o_ref[...] = jnp.broadcast_to(b_ref[...], o_ref.shape)

    # AvgPool2d(7): sum over the H*W sublane axis with the bf16->f32 cast
    # fused into the reduction (no materialized f32 tile). 1/(H*W) is folded
    # into the weight on the host side.
    pooled = jnp.sum(x_ref[...], axis=1, dtype=jnp.float32)       # (tn, tc)

    if w_resident:
        # Whole weight lives in VMEM (constant index_map => single DMA);
        # slice out this step's tc chunk in-kernel.
        w = w_ref[pl.ds(pl.multiple_of(c * tc, tc), tc), :]
    else:
        w = w_ref[...]

    # Partial FC contraction for this C tile on the MXU (bf16 in, f32 acc),
    # accumulated directly into the resident output block.
    o_ref[...] += jnp.dot(pooled.astype(jnp.bfloat16), w,
                          preferred_element_type=jnp.float32)


@functools.partial(jax.jit, static_argnames=("tile_n", "tile_c"))
def classify(x_nchw, fc_weight, fc_bias, *, tile_n=128, tile_c=512):
    """AvgPool2d(7) -> Flatten -> Linear (PyTorch `Classify.forward`).

    x_nchw:    (N, C, H, W) activation (H*W is the pooled window, e.g. 7x7).
    fc_weight: (K, C) PyTorch nn.Linear weight.
    fc_bias:   (K,)   PyTorch nn.Linear bias.
    Returns (N, K) float32 logits.
    """
    N, C, H, W = x_nchw.shape
    K = fc_weight.shape[0]
    HW = H * W
    Kp = _round_up(K, LANE)

    assert tile_n % 8 == 0 and tile_c % LANE == 0

    # Tile selection: C is on the lane axis, so tc must be a multiple of 128
    # (or the full axis); tn only needs sublane (8) alignment or the full axis.
    if N <= tile_n:
        tn, Np = N, N
    else:
        tn, Np = tile_n, _round_up(N, tile_n)
    if C <= tile_c:
        tc, Cp = C, C
    else:
        tc, Cp = tile_c, _round_up(C, tile_c)

    # Single fused HBM relayout pass: NCHW f32 -> (N, HW, C) bf16, with zero
    # padding along N / C (zeros are exact for both the pool-sum and the dot).
    # TODO(synk): ideally the producing layer already emits bf16 (N, HW, C)
    # activations so this relayout pass disappears entirely.
    xk = jnp.transpose(x_nchw.reshape(N, C, HW), (0, 2, 1)).astype(jnp.bfloat16)
    xk = jnp.pad(xk, ((0, Np - N), (0, 0), (0, Cp - C)))

    # Fold 1/(H*W) into the pre-transposed FC weight; zero-pad C and K so the
    # output block is lane-dense (unmasked stores).
    wt = jnp.pad((fc_weight.T / float(HW)).astype(jnp.bfloat16),
                 ((0, Cp - C), (0, Kp - K)))
    bk = jnp.pad(fc_bias.astype(jnp.float32), (0, Kp - K)).reshape(1, Kp)

    # Hold the whole weight VMEM-resident when it is small enough (one DMA
    # total instead of re-streaming C/tc blocks per N tile); otherwise stream.
    n_c_blocks = Cp // tc
    w_resident = n_c_blocks > 1 and (Cp * Kp * 2) <= 12 * 1024 * 1024
    if w_resident:
        w_spec = pl.BlockSpec((Cp, Kp), lambda i, c: (0, 0))
    else:
        w_spec = pl.BlockSpec((tc, Kp), lambda i, c: (c, 0))

    kernel = functools.partial(classify_kernel, w_resident=w_resident, tc=tc)

    out = pl.pallas_call(
        kernel,
        out_shape=jax.ShapeDtypeStruct((Np, Kp), jnp.float32),
        grid_spec=pltpu.PrefetchScalarGridSpec(
            num_scalar_prefetch=0,
            grid=(Np // tn, n_c_blocks),
            in_specs=[
                pl.BlockSpec((tn, HW, tc), lambda i, c: (i, 0, c)),
                w_spec,
                pl.BlockSpec((1, Kp), lambda i, c: (0, 0)),
            ],
            out_specs=pl.BlockSpec((tn, Kp), lambda i, c: (i, 0)),
        ),
        compiler_params=pltpu.CompilerParams(
            dimension_semantics=("parallel", "arbitrary"),
            # Working set at the defaults for real AmoebaNet shapes
            # (C~4320, K=1000):
            #   2 x (128 * 64 * 512 * 2B)  = 16 MiB  x tiles (double-buffered)
            #   resident weight            <= ~18 MiB (<=9 MiB x 2 buffers)
            #   2 x (128 * 1024 * 4B)      =  1 MiB  output blocks
            # -> ~35 MiB, fits v7x's 64 MiB physical VMEM with headroom and
            #    needs the scoped limit raised above the 16/32 MiB defaults.
            vmem_limit_bytes=64 * 1024 * 1024,
        ),
    )(xk, wt, bk)

    return out[:N, :K]


if __name__ == "__main__":
    # AvgPool2d(7) requires a 7x7 map so Flatten yields exactly channels_prev
    # features for the Linear layer.
    N, C, H, W = 2, 32, 7, 7
    num_classes = 10

    key = jax.random.PRNGKey(0)
    kx, kw, kb = jax.random.split(key, 3)
    x = jax.random.normal(kx, (N, C, H, W), dtype=jnp.float32)
    fc_weight = jax.random.normal(kw, (num_classes, C), dtype=jnp.float32) * 0.05
    fc_bias = jax.random.normal(kb, (num_classes,), dtype=jnp.float32) * 0.05

    out = jax.block_until_ready(classify(x, fc_weight, fc_bias))
    assert out.shape == (N, num_classes)

    # Full-f32 PyTorch-semantics reference (bf16-level tolerance).
    pooled = jnp.mean(x, axis=(2, 3))
    ref = pooled @ fc_weight.T + fc_bias
    assert jnp.allclose(out, ref, atol=2e-2, rtol=2e-2), (
        float(jnp.max(jnp.abs(out - ref))))

    print("KERNEL_OK")
</pallas_src>

<mosaic_0001>
module attributes {stable_mosaic.version = 11 : i64} {
  func.func @classify_kernel(%arg0: i32, %arg1: i32, %arg2: memref<2x49x32xbf16, #tpu.memory_space<vmem>>, %arg3: memref<32x128xbf16, #tpu.memory_space<vmem>>, %arg4: memref<1x128xf32, #tpu.memory_space<vmem>>, %arg5: memref<2x128xf32, #tpu.memory_space<vmem>>) attributes {dimension_semantics = [#tpu.dimension_semantics<parallel>, #tpu.dimension_semantics<arbitrary>], iteration_bounds = array<i64: 1, 1>, scalar_prefetch = 0 : i64, scratch_operands = 0 : i64, tpu.core_type = #tpu.core_type<tc>, window_params = [{transform_indices = @transform_0, window_bounds = array<i64: 2, 49, 32>}, {transform_indices = @transform_1, window_bounds = array<i64: 32, 128>}, {pipeline_mode = #tpu.pipeline_mode<synchronous>, transform_indices = @transform_2, window_bounds = array<i64: 1, 128>}, {transform_indices = @transform_3, window_bounds = array<i64: 2, 128>}]} {
    %c0_i32 = arith.constant 0 : i32
    %0 = arith.cmpi eq, %arg1, %c0_i32 : i32
    %1 = arith.extui %0 : i1 to i32
    %c0_i32_0 = arith.constant 0 : i32
    %2 = arith.cmpi ne, %1, %c0_i32_0 : i32
    scf.if %2 {
      %c0_10 = arith.constant 0 : index
      %c0_11 = arith.constant 0 : index
      %12 = vector.load %arg4[%c0_10, %c0_11] : memref<1x128xf32, #tpu.memory_space<vmem>>, vector<1x128xf32>
      %13 = vector.shape_cast %12 : vector<1x128xf32> to vector<1x128xf32>
      %14 = vector.broadcast %13 : vector<1x128xf32> to vector<2x128xf32>
      %c0_12 = arith.constant 0 : index
      %c0_13 = arith.constant 0 : index
      %15 = vector.load %arg5[%c0_12, %c0_13] : memref<2x128xf32, #tpu.memory_space<vmem>>, vector<2x128xf32>
      tpu.vector_store %arg5[%c0_12, %c0_13], %14 {strides = array<i32>} : memref<2x128xf32, #tpu.memory_space<vmem>>, vector<2x128xf32>,
    } else {
    }
    %c0 = arith.constant 0 : index
    %c0_1 = arith.constant 0 : index
    %c0_2 = arith.constant 0 : index
    %3 = vector.load %arg2[%c0, %c0_1, %c0_2] : memref<2x49x32xbf16, #tpu.memory_space<vmem>>, vector<2x49x32xbf16>
    %4 = arith.extf %3 : vector<2x49x32xbf16> to vector<2x49x32xf32>
    %cst = arith.constant dense<0.000000e+00> : vector<2x32xf32>
    %5 = vector.multi_reduction <add>, %4, %cst [1] : vector<2x49x32xf32> to vector<2x32xf32>
    %c0_3 = arith.constant 0 : index
    %c0_4 = arith.constant 0 : index
    %6 = vector.load %arg3[%c0_3, %c0_4] : memref<32x128xbf16, #tpu.memory_space<vmem>>, vector<32x128xbf16>
    %c0_5 = arith.constant 0 : index
    %c0_6 = arith.constant 0 : index
    %7 = vector.load %arg5[%c0_5, %c0_6] : memref<2x128xf32, #tpu.memory_space<vmem>>, vector<2x128xf32>
    %8 = arith.truncf %5 : vector<2x32xf32> to vector<2x32xbf16>
    %cst_7 = arith.constant dense<0.000000e+00> : vector<2x128xf32>
    %9 = tpu.matmul %8, %6, %cst_7 {dimension_numbers = #tpu.dot_dimension_numbers<[1], [0], [0], [1], [0, 0, 1, 1], [], []>} : vector<2x32xbf16>, vector<32x128xbf16>, vector<2x128xf32> -> vector<2x128xf32>
    %10 = arith.addf %7, %9 : vector<2x128xf32>
    %c0_8 = arith.constant 0 : index
    %c0_9 = arith.constant 0 : index
    %11 = vector.load %arg5[%c0_8, %c0_9] : memref<2x128xf32, #tpu.memory_space<vmem>>, vector<2x128xf32>
    tpu.vector_store %arg5[%c0_8, %c0_9], %10 {strides = array<i32>} : memref<2x128xf32, #tpu.memory_space<vmem>>, vector<2x128xf32>,
    return
  }
  func.func @transform_0(%arg0: i32, %arg1: i32) -> (i32, i32, i32) {
    %c0_i32 = arith.constant 0 : i32
    %c0_i32_0 = arith.constant 0 : i32
    return %arg0, %c0_i32, %arg1 : i32, i32, i32
  }
  func.func @transform_1(%arg0: i32, %arg1: i32) -> (i32, i32) {
    %c0_i32 = arith.constant 0 : i32
    %c0_i32_0 = arith.constant 0 : i32
    return %arg1, %c0_i32 : i32, i32
  }
  func.func @transform_2(%arg0: i32, %arg1: i32) -> (i32, i32) {
    %c0_i32 = arith.constant 0 : i32
    %c0_i32_0 = arith.constant 0 : i32
    %c0_i32_1 = arith.constant 0 : i32
    return %c0_i32, %c0_i32_0 : i32, i32
  }
  func.func @transform_3(%arg0: i32, %arg1: i32) -> (i32, i32) {
    %c0_i32 = arith.constant 0 : i32
    %c0_i32_0 = arith.constant 0 : i32
    return %arg0, %c0_i32 : i32, i32
  }
}

</mosaic_0001>

<bundles_post_ra>
// kernel: classify.1
= control target key start
LH: loop header
LB: loop body
LE: loop exit
PB: predicated region body
PF: predicated region fallthrough
CT: control target
= control target key end

     0   :  { %8 = vsyncpa [#allocation3], 0  ;;  %s461_s0 = inlined_call_operand.hbm [shape: bf16[2,49,32], index: 0, kind: input, shape index: {}]   ;;  %s462_s1 = inlined_call_operand.hbm [shape: bf16[32,128], index: 1, kind: input, shape index: {}]   ;;  %s463_s2 = inlined_call_operand.hbm [shape: f32[1,128], index: 2, kind: input, shape index: {}]   ;;  %s464_s3 = inlined_call_operand.hbm [shape: f32[2,128], index: 3, kind: output, shape index: {}]  }
   0x1   :  { %9 = vsyncpa [#allocation6], 0 }
   0x2   :  { %10 = vsyncpa [#allocation4], 0  ;;  %s365_s12 = smov [#allocation5]   ;;  %s366_s14 = smov [#allocation2]  }
   0x3   :  { %s28_s13 = sshll.u32 %s365_s12, 4  ;;  %s16_s15 = sshll.u32 %s366_s14, 4  ;;  %s29_s13 = int_to_ptr.vmem [resolvable:$true] %s28_s13  ;;  %s393_s15 = int_to_ptr.vmem [resolvable:$true] %s16_s15 }
   0x4   :  { %s271_s18 = scalar_lea.hbm %s462_s1, 256 }
   0x5   :  { %p272_p0 = scmp.ne.s32.totalorder %s462_s1, %s271_s18  ;;  %p275_p1 = scmp.lt.u32.totalorder %s271_s18, %s462_s1 }
   0x7   :  { %p277_p2 = pnand %p275_p1, %p272_p0 }
   0x9   :  { %280 = shalt.err (!%p277_p2)
}
   0xa   :  { %s281_s23 = scalar_lea.vmem %s29_s13, 256  ;;  %p286_p4 = scmp.lt.s32.totalorder %s29_s13, %s29_s13 }
   0xb   :  { %p282_p3 = scmp.ne.s32.totalorder %s29_s13, %s281_s23  ;;  %p287_p5 = scmp.lt.s32.totalorder %s281_s23, %s281_s23 }
   0xd   :  { %p288_p6 = por %p287_p5, %p286_p4 }
   0xf   :  { %p289_p7 = pnand %p288_p6, %p282_p3 }
  0x11   :  { %292 = shalt.err (!%p289_p7)
}
  0x12   :  { %s367_s24 = smov 64   ;;  %s368_s25 = smov 4  }
  0x13   :  { %34 = dma.hbm_to_vmem [thread:$0]  %s462_s1, 256, %s29_s13, [#allocation6], %s367_s24, %s367_s24, %s368_s25  }
  0x14   :  { %s293_s30 = scalar_lea.hbm %s461_s0, 896 }
  0x15   :  { %p294_p8 = scmp.ne.s32.totalorder %s461_s0, %s293_s30  ;;  %p297_p9 = scmp.lt.u32.totalorder %s293_s30, %s461_s0 }
  0x17   :  { %p299_p10 = pnand %p297_p9, %p294_p8 }
  0x19   :  { %302 = shalt.err (!%p299_p10)
}
  0x1a   :  { %s303_s8 = scalar_lea.vmem %s393_s15, 896  ;;  %p308_p12 = scmp.lt.s32.totalorder %s393_s15, %s393_s15 }
  0x1b   :  { %p304_p11 = scmp.ne.s32.totalorder %s393_s15, %s303_s8  ;;  %p309_p13 = scmp.lt.s32.totalorder %s303_s8, %s303_s8 }
  0x1d   :  { %p310_p0 = por %p309_p13, %p308_p12 }
  0x1f   :  { %p311_p1 = pnand %p310_p0, %p304_p11 }
  0x21   :  { %314 = shalt.err (!%p311_p1)
}
  0x22   :  { %22 = dma.hbm_to_vmem [thread:$0]  %s461_s0, 896, %s393_s15, [#allocation3], %s367_s24, %s367_s24, %s368_s25  }
  0x23   :  { %s369_s10 = smov [#allocation7]   ;;  %s315_s14 = scalar_lea.hbm %s463_s2, 16 }
  0x24   :  { %s41_s11 = sshll.u32 %s369_s10, 4  ;;  %p316_p2 = scmp.ne.s32.totalorder %s463_s2, %s315_s14  ;;  %s42_s11 = int_to_ptr.vmem [resolvable:$true] %s41_s11 }
  0x25   :  { %p319_p3 = scmp.lt.u32.totalorder %s315_s14, %s463_s2 }
  0x27   :  { %p321_p4 = pnand %p319_p3, %p316_p2 }
  0x29   :  { %324 = shalt.err (!%p321_p4)
}
  0x2a   :  { %s325_s20 = scalar_lea.vmem %s42_s11, 16  ;;  %s329_s0 = scalar_lea.vmem %s42_s11, 32 }
  0x2b   :  { %p326_p5 = scmp.ne.s32.totalorder %s42_s11, %s325_s20  ;;  %p330_p6 = scmp.lt.s32.totalorder %s42_s11, %s42_s11 }
  0x2c   :  { %p331_p7 = scmp.lt.s32.totalorder %s329_s0, %s325_s20 }
  0x2e   :  { %p332_p8 = por %p331_p7, %p330_p6 }
  0x30   :  { %p333_p9 = pnand %p332_p8, %p326_p5 }
  0x32   :  { %336 = shalt.err (!%p333_p9)
}
  0x33   :  { %44 = dma.hbm_to_vmem [thread:$0]  %s463_s2, 16, %s42_s11, [#allocation6]  }
  0x34   :  { %359 = dma.done.wait [#allocation3], 896  }
  0x35   :  { %360 = vsyncadd [#allocation3], 4294966400 }
  0x36   :  { %361 = dma.done.wait [#allocation6], 272  }
  0x37   :  { %362 = vsyncadd [#allocation6], 4294967024  ;;  %v370_v0 = vmov 0.0   ;;  %vm371_vm0 = vmmov 0   ;;  %v269_v1 = vld [vmem:[#allocation5] sm:$0xff]   ;;  %v270_v2 = vld [vmem:[#allocation5 + $0x8] sm:$0xff]  }
  0x38   :  { %253 = vmatprep.subr.bf16.mxu0 %v370_v0  ;;  %257 = vmatprep.mubr.msk.bf16.mxu0 %vm371_vm0, %v370_v0  ;;  %v227_v3 = vld [vmem:[#allocation2] sm:$0xff]   ;;  %v246_v4 = vld [vmem:[#allocation2 + $0x8] sm:$0xff]   ;;  %v247_v8 = vld [vmem:[#allocation2 + $0x10] sm:$0xff]   ;;  %vm95_vm1 = vcmask 261120   ;;  %vm107_vm2 = vcmask 253952   ;;  %vm146_vm3 = vcmask 1041409  }
  0x39   :  { %254 = vmatpush3.bf16.msra.mxu0 %v269_v1  ;;  %v228_v5 = vunpack.c.l.bf16 %v227_v3  ;;  %v229_v6 = vunpack.c.h.bf16 %v227_v3  ;;  %v232_v7 = vunpack.c.l.bf16 %v246_v4  ;;  %v74_v9 = vld [vmem:[#allocation2 + $0x1c] ss:$20 sps:$4 sm:$0xff]   ;;  %v248_v10 = vld [vmem:[#allocation2 + $0x20] sm:$0xff]   ;;  %v233_v11 = vunpack.c.h.bf16 %v246_v4  ;;  %v249_v13 = vld [vmem:[#allocation2 + $0x28] sm:$0xff]   ;;  %s372_s2 = smov [#allocation8]  }
  0x3a   :  { %255 = vmatprep.subr.bf16.mxu0 %v370_v0  ;;  %v240_v12 = vunpack.c.l.bf16 %v248_v10  ;;  %v222_v14 = vld [vmem:[#allocation7] ss:$0 sm:$0xff]  ;;  %v241_v15 = vunpack.c.h.bf16 %v248_v10  ;;  %v88_v16 = vunpack.c.l.bf16 %v74_v9  ;;  %v236_v17 = vunpack.c.l.bf16 %v247_v8  ;;  %v73_v22 = vld [vmem:[#allocation2 + $0x18] sm:$0x1]  ;;  %v80_v29 = vld [vmem:[#allocation2 + $0x34] sm:$0x1] }
  0x3b   :  { %66 = vst [vmem:[#allocation8] sm:$0x3] %v222_v14  ;;  %v244_v18 = vunpack.c.l.bf16 %v249_v13  ;;  %v96_v19 = vsel %vm95_vm1, %v228_v5, 0.0  ;;  %v97_v20 = vsel %vm95_vm1, %v229_v6, 0.0  ;;  %v237_v21 = vunpack.c.h.bf16 %v247_v8  ;;  %s212_s22 = sshll.u32 %s372_s2, 4  ;;  %s213_s22 = int_to_ptr.vmem [resolvable:$true] %s212_s22 }
  0x3c   :  { %v98_v23 = vadd.f32 %v97_v20, %v96_v19  ;;  %v99_v24 = vsel %vm95_vm1, %v232_v7, 0.0  ;;  %v245_v25 = vunpack.c.h.bf16 %v249_v13  ;;  %v101_v26 = vsel %vm95_vm1, %v233_v11, 0.0  ;;  %s337_s23 = scalar_lea.vmem %s213_s22, 32  ;;  %p342_p11 = scmp.lt.s32.totalorder %s213_s22, %s213_s22 }
  0x3d   :  { %256 = vmatpush3.bf16.msra.mxu0 %v270_v2  ;;  %v116_v27 = vsel %vm95_vm1, %v88_v16, 0.0  ;;  %v117_v28 = vsel %vm95_vm1, %v240_v12, 0.0  ;;  %v119_v32 = vsel %vm95_vm1, %v241_v15, 0.0  ;;  %v87_v33 = vunpack.c.l.bf16 %v73_v22  ;;  %p338_p10 = scmp.ne.s32.totalorder %s213_s22, %s337_s23  ;;  %p343_p12 = scmp.lt.s32.totalorder %s337_s23, %s337_s23 }
  0x3e   :  { %v100_v30 = vadd.f32 %v99_v24, %v98_v23  ;;  %v118_v31 = vadd.f32 %v117_v28, %v116_v27  ;;  %v93_v34 = vunpack.c.h.bf16 %v74_v9  ;;  %v103_v35 = vsel %vm95_vm1, %v236_v17, 0.0 }
  0x3f   :  { %v121_v36 = vsel %vm95_vm1, %v244_v18, 0.0  ;;  %v94_v39 = vunpack.c.l.bf16 %v80_v29  ;;  %v105_v40 = vsel %vm95_vm1, %v237_v21, 0.0  ;;  %v123_v41 = vsel %vm95_vm1, %v245_v25, 0.0  ;;  %p344_p13 = por %p343_p12, %p342_p11 }
  0x40   :  { %v102_v37 = vadd.f32 %v101_v26, %v100_v30  ;;  %v120_v38 = vadd.f32 %v119_v32, %v118_v31  ;;  %v108_v44 = vsel %vm107_vm2, %v87_v33, 0.0  ;;  %v125_v45 = vsel %vm95_vm1, %v93_v34, 0.0 }
  0x41   :  { %v127_v48 = vsel %vm107_vm2, %v94_v39, 0.0  ;;  %p345_p0 = pnand %p344_p13, %p338_p10 }
  0x42   :  { %v104_v42 = vadd.f32 %v103_v35, %v102_v37  ;;  %v122_v43 = vadd.f32 %v121_v36, %v120_v38  ;;  %v139_v6 = vld [vmem:[#allocation8] sm:$0x3] }
  0x44   :  { %v106_v46 = vadd.f32 %v105_v40, %v104_v42  ;;  %v124_v47 = vadd.f32 %v123_v41, %v122_v43 }
  0x46   :  { %v109_v49 = vadd.f32 %v108_v44, %v106_v46  ;;  %v126_v50 = vadd.f32 %v125_v45, %v124_v47 }
  0x48   :  { %v110_v51 = vrot.slane %v109_v49, 4  ;;  %v128_v52 = vadd.f32 %v127_v48, %v126_v50 }
  0x4a   :  { %v111_v53 = vadd.f32 %v110_v51, %v109_v49  ;;  %v129_v54 = vrot.slane %v128_v52, 4 }
  0x4c   :  { %v112_v55 = vrot.slane %v111_v53, 2  ;;  %v130_v56 = vadd.f32 %v129_v54, %v128_v52 }
  0x4e   :  { %v113_v57 = vadd.f32 %v112_v55, %v111_v53  ;;  %v131_v58 = vrot.slane %v130_v56, 2 }
  0x50   :  { %v114_v59 = vrot.slane %v113_v57, 1  ;;  %v132_v60 = vadd.f32 %v131_v58, %v130_v56 }
  0x52   :  { %v115_v61 = vadd.f32 %v114_v59, %v113_v57  ;;  %v133_v62 = vrot.slane %v132_v60, 1 }
  0x54   :  { %v134_v63 = vadd.f32 %v133_v62, %v132_v60  ;;  %v140_v0 = vpack.c.bf16 %v115_v61, %v115_v61 }
  0x56   :  { %v141_v1 = vpack.c.bf16 %v134_v63, %v134_v63  ;;  %v144_v2 = vunpack.c.l.b16 %v140_v0 }
  0x58   :  { %v145_v3 = vunpack.c.l.b16 %v141_v1 }
  0x5a   :  { %v147_v4 = vsel %vm146_vm3, %v145_v3, %v144_v2 }
  0x5b   :  { %v148_v5 = vpack.c.b16 %v147_v4, %v147_v4 }
  0x5d   :  { %258 = vmatmul.mubr.msk.bf16.vlgmr.msra.gmra.mrb[0].mxu0 %vm95_vm1, %v148_v5 }
 0x130   :  { %v198_v7 = vpop.f32.mrb[0].mxu0 }
 0x131   :  { %v204_v8 = vadd.f32 %v198_v7, %v139_v6  ;;  %v259_v9 = vpop.f32.mrb[1].mxu0 }
 0x132   :  { %v201_v10 = vpop.f32.mrb[2].mxu0 }
 0x133   :  { %205 = vst [vmem:[#allocation8] sm:$0x3] %v204_v8  ;;  %v260_v11 = vpop.f32.mrb[3].mxu0 }
 0x134   :  { %348 = shalt.err (!%p345_p0)
}
 0x135   :  { %s349_s26 = scalar_lea.hbm %s464_s3, 32 }
 0x136   :  { %p350_p1 = scmp.ne.s32.totalorder %s464_s3, %s349_s26  ;;  %p353_p2 = scmp.lt.u32.totalorder %s349_s26, %s464_s3 }
 0x138   :  { %p355_p3 = pnand %p353_p2, %p350_p1 }
 0x13a   :  { %358 = shalt.err (!%p355_p3)
}
 0x13b   :  { %215 = dma.vmem_to_hbm [thread:$0]  %s213_s22, 32, %s464_s3, [#allocation4]  }
 0x13c   :  { %363 = dma.done.wait [#allocation4], 32  }
 0x13d   :  { %364 = vsyncadd [#allocation4], 4294967264 }
 0x13e   :  { %219 = vsyncpa [#allocation3], 1 }
 0x13f   :  { %220 = vsyncpa [#allocation6], 1 }
 0x140   :  { %221 = vsyncpa [#allocation4], 1 }

</bundles_post_ra>
